<compile_context>
chip_gen: v6e
topology: v6e:2x2x1
jax: 0.10.0
libtpu: 0.0.40
codegen_flags: <defaults>
</compile_context>

<pallas_src>
import jax
import jax.numpy as jnp
from jax.experimental import pallas as pl
from jax.experimental.pallas import tpu as pltpu

_PAD = 16  # channel padding granularity (bf16 sublane packing, clean f32 slices)


def _rup(x, m=_PAD):
    return ((x + m - 1) // m) * m


def _vmem_limit_and_budget():
    """Generation-aware VMEM numbers (v5e/v6e: 128 MiB physical, v7x: 64 MiB)."""
    try:
        cap = int(pltpu.get_tpu_info().vmem_capacity_bytes)
    except Exception:
        cap = 64 * 1024 * 1024          # conservative: assume the smallest (v7x)
    limit = min(48 * 1024 * 1024, (cap * 3) // 4)   # scoped-VMEM limit to request
    budget = cap // 4                               # budget for tile selection
    return limit, budget


def _pick_tile_m(n, *, c_in, layer_dims, c1, vmem_budget):
    # Rough per-point VMEM bytes: double-buffered f32 input tile, double-buffered
    # bf16 partial1 output tile, plus a few copies of the widest f32 temporary.
    widest = max([c_in + c1] + [c1 + d for d in layer_dims])
    per_point = (c_in * 4 * 2) + (c1 * 2 * 2) + widest * 4 * 4
    cap = max(128, vmem_budget // max(per_point, 1))
    for t in (2048, 1024, 512, 256, 128):
        if t <= cap and n % t == 0:
            return t
    return n  # TODO(synk): masked-tail handling for N not a multiple of 128


# ----------------------------------------------------------------------------
# Kernel 1: fused point branch + first-classifier partial sum + global-max
#           accumulator.  Layout: (channels, points) per tile.
#           Each stacked weight is [wc_split ; next_layer_w]  -> one MXU pass
#           per layer feeds both the classifier partial and the next layer.
# ----------------------------------------------------------------------------
def _make_point_branch_kernel(num_layers, c1):
    L = num_layers

    def kernel(*refs):
        x_ref = refs[0]
        stacked_refs = refs[1:1 + L]
        bias_refs = refs[1 + L:1 + 2 * L]
        wc_last_ref = refs[1 + 2 * L]
        partial_ref, gmax_ref = refs[-2], refs[-1]

        x = x_ref[...]                                       # (C_in, tile_m) f32
        acc = None
        for i in range(L):
            y = jnp.dot(stacked_refs[i][...], x.astype(jnp.bfloat16),
                        preferred_element_type=jnp.float32)  # (c1 + p_i, tile_m)
            part = y[:c1]                                    # classifier split rows
            acc = part if acc is None else acc + part
            x = jnp.maximum(y[c1:] + bias_refs[i][...], 0.0)  # next activation f32
        acc = acc + jnp.dot(wc_last_ref[...], x.astype(jnp.bfloat16),
                            preferred_element_type=jnp.float32)

        partial_ref[...] = acc.astype(partial_ref.dtype)     # bf16 HBM store

        # running global max over the point axis of the LAST layer's activations
        tile_max = jnp.max(x, axis=1, keepdims=True)         # (C_last_p, 1)

        @pl.when(pl.program_id(1) == 0)
        def _():
            gmax_ref[...] = tile_max

        @pl.when(pl.program_id(1) != 0)
        def _():
            gmax_ref[...] = jnp.maximum(gmax_ref[...], tile_max)

    return kernel


def _point_branch_call(inputs_ncl, stacked, biases, wc_last_t, c1, c_last_p,
                       *, tile_m, vmem_limit):
    B, C_in, N = inputs_ncl.shape
    L = len(stacked)
    grid = (B, N // tile_m)

    in_specs = [pl.BlockSpec((None, C_in, tile_m), lambda b, m: (b, 0, m))]
    flat = [inputs_ncl]
    for s in stacked:
        in_specs.append(pl.BlockSpec(s.shape, lambda b, m: (0, 0)))
        flat.append(s)
    for bb in biases:
        in_specs.append(pl.BlockSpec(bb.shape, lambda b, m: (0, 0)))
        flat.append(bb)
    in_specs.append(pl.BlockSpec(wc_last_t.shape, lambda b, m: (0, 0)))
    flat.append(wc_last_t)

    out_shape = [jax.ShapeDtypeStruct((B, c1, N), jnp.bfloat16),
                 jax.ShapeDtypeStruct((B, c_last_p, 1), jnp.float32)]
    out_specs = [pl.BlockSpec((None, c1, tile_m), lambda b, m: (b, 0, m)),
                 pl.BlockSpec((None, c_last_p, 1), lambda b, m: (b, 0, 0))]

    return pl.pallas_call(
        _make_point_branch_kernel(L, c1),
        out_shape=out_shape,
        grid_spec=pltpu.PrefetchScalarGridSpec(
            num_scalar_prefetch=0, grid=grid,
            in_specs=in_specs, out_specs=out_specs),
        compiler_params=pltpu.CompilerParams(
            dimension_semantics=("parallel", "arbitrary"),
            vmem_limit_bytes=vmem_limit),
    )(*flat)


# ----------------------------------------------------------------------------
# Kernel 2: fused classifier.  Adds the per-batch (gmax projection + bias)
#           column, ReLU, the remaining hidden layers and the final conv.
#           Output is written lane-dense as (num_classes, tile_m).
# ----------------------------------------------------------------------------
def _make_classifier_kernel(num_hidden):
    H = num_hidden

    def kernel(*refs):
        p_ref, g_ref = refs[0], refs[1]
        layer_refs = refs[2:2 + 2 * H]
        w_last_ref = refs[2 + 2 * H]
        b_last_ref = refs[3 + 2 * H]
        out_ref = refs[-1]

        # finish first classifier layer: per-point partial (bf16) + per-batch term
        h = jnp.maximum(p_ref[...].astype(jnp.float32) + g_ref[...], 0.0)
        for i in range(H):
            w = layer_refs[2 * i][...]                        # bf16
            b = layer_refs[2 * i + 1][...]                    # f32 (oc, 1)
            h = jnp.maximum(
                jnp.dot(w, h.astype(jnp.bfloat16),
                        preferred_element_type=jnp.float32) + b, 0.0)
        out_ref[...] = (jnp.dot(w_last_ref[...], h.astype(jnp.bfloat16),
                                preferred_element_type=jnp.float32)
                        + b_last_ref[...]).astype(out_ref.dtype)

    return kernel


def _classifier_call(partial1, gproj, cls_hidden, w_last_t, b_last,
                     *, tile_m, vmem_limit):
    B, C1, N = partial1.shape
    nc = w_last_t.shape[0]
    grid = (B, N // tile_m)

    in_specs = [pl.BlockSpec((None, C1, tile_m), lambda b, m: (b, 0, m)),
                pl.BlockSpec((None, C1, 1), lambda b, m: (b, 0, 0))]
    flat = [partial1, gproj]
    for (w_t, bcol) in cls_hidden:
        in_specs.append(pl.BlockSpec(w_t.shape, lambda b, m: (0, 0)))
        in_specs.append(pl.BlockSpec(bcol.shape, lambda b, m: (0, 0)))
        flat += [w_t, bcol]
    in_specs.append(pl.BlockSpec(w_last_t.shape, lambda b, m: (0, 0)))
    in_specs.append(pl.BlockSpec(b_last.shape, lambda b, m: (0, 0)))
    flat += [w_last_t, b_last]

    return pl.pallas_call(
        _make_classifier_kernel(len(cls_hidden)),
        out_shape=jax.ShapeDtypeStruct((B, nc, N), jnp.float32),
        grid_spec=pltpu.PrefetchScalarGridSpec(
            num_scalar_prefetch=0, grid=grid,
            in_specs=in_specs,
            out_specs=pl.BlockSpec((None, nc, tile_m), lambda b, m: (b, 0, m))),
        compiler_params=pltpu.CompilerParams(
            dimension_semantics=("parallel", "parallel"),
            vmem_limit_bytes=vmem_limit),
    )(*flat)


# ----------------------------------------------------------------------------
# Deterministic parameter construction: conv weight + conv bias + eval-mode BN
# folded into (w, b); BN scale folded INTO the weight.
# ----------------------------------------------------------------------------
def _make_layer_params(key, cin, cout, *, with_bn=True):
    k1, k2, k3, k4, k5, k6 = jax.random.split(key, 6)
    w = jax.random.normal(k1, (cin, cout), jnp.float32) / jnp.sqrt(float(cin))
    b = 0.1 * jax.random.normal(k2, (cout,), jnp.float32)
    if with_bn:
        gamma = 1.0 + 0.1 * jax.random.normal(k3, (cout,), jnp.float32)
        beta = 0.1 * jax.random.normal(k4, (cout,), jnp.float32)
        run_mean = 0.1 * jax.random.normal(k5, (cout,), jnp.float32)
        run_var = 1.0 + 0.1 * jnp.abs(jax.random.normal(k6, (cout,), jnp.float32))
        scale = gamma / jnp.sqrt(run_var + 1e-5)
        w = w * scale[None, :]                      # fold BN scale into weight
        b = (b - run_mean) * scale + beta
    return w, b                                     # w: (cin, cout), b: (cout,)


def init_shapenet_pvcnn_params(key, *, in_channels, blocks, num_shapes,
                               num_classes, width_multiplier=1.0):
    r = width_multiplier
    keys = jax.random.split(key, 64)
    ki = iter(range(64))

    # --- point branch (create_pointnet_components, voxel_resolution=None) ---
    point_true = []            # [(w (cin_t, cout_t), b (cout_t,))]
    true_channels = []
    c = in_channels
    for out_channels, num_blocks, voxel_resolution in blocks:
        assert voxel_resolution is None  # TODO(synk): PVConv voxel branch
        oc = int(r * out_channels)
        for _ in range(num_blocks):
            w, b = _make_layer_params(keys[next(ki)], c, oc, with_bn=True)
            point_true.append((w, b))
            true_channels.append(oc)
            c = oc
    channels_point = c
    concat = sum(true_channels)
    L = len(point_true)

    # --- first classifier layer, split row-wise per concat source -----------
    # concat order: [one_hot (S), x_1, ..., x_L, gmax (channels_point)]
    cls_in = num_shapes + channels_point + concat
    c1_true = int(r * 256)
    w1, b1 = _make_layer_params(keys[next(ki)], cls_in, c1_true, with_bn=True)
    off = 0
    wc_oh = w1[off:off + num_shapes]; off += num_shapes
    wc_layers = []
    for oc in true_channels:
        wc_layers.append(w1[off:off + oc]); off += oc
    wc_g = w1[off:off + channels_point]; off += channels_point
    assert off == cls_in

    # --- channel padding + stacked (shared-RHS) weights in bf16 -------------
    C1 = _rup(c1_true)
    padded_channels = [_rup(oc) for oc in true_channels]

    stacked, biases = [], []
    prev_dim = in_channels
    for k in range(L):
        cout_t = true_channels[k]
        p_out = padded_channels[k]
        w, b = point_true[k]                                   # (prev_t, cout_t)
        prev_true = in_channels if k == 0 else true_channels[k - 1]
        w_t = jnp.zeros((p_out, prev_dim), jnp.float32)
        w_t = w_t.at[:cout_t, :prev_true].set(jnp.transpose(w))
        bias = jnp.zeros((p_out, 1), jnp.float32).at[:cout_t, 0].set(b)
        wc_t = jnp.zeros((C1, prev_dim), jnp.float32)
        if k == 0:
            # one-hot split acts on the LAST num_shapes raw input channels
            # (matches `one_hot_vectors = inputs[:, -num_shapes:, :]`).
            wc_t = wc_t.at[:c1_true, prev_dim - num_shapes:].set(
                jnp.transpose(wc_oh))
        else:
            wc_t = wc_t.at[:c1_true, :prev_true].set(
                jnp.transpose(wc_layers[k - 1]))
        stacked.append(jnp.concatenate([wc_t, w_t], axis=0).astype(jnp.bfloat16))
        biases.append(bias)
        prev_dim = p_out

    c_last_p = padded_channels[L - 1]
    wc_last_t = jnp.zeros((C1, c_last_p), jnp.float32)
    wc_last_t = wc_last_t.at[:c1_true, :channels_point].set(
        jnp.transpose(wc_layers[L - 1])).astype(jnp.bfloat16)

    wc_g_p = jnp.zeros((c_last_p, C1), jnp.float32)
    wc_g_p = wc_g_p.at[:channels_point, :c1_true].set(wc_g)
    b_cls1_p = jnp.zeros((C1,), jnp.float32).at[:c1_true].set(b1)

    # --- remaining classifier layers: [256, .2, 256, .2, 128, num_classes] ---
    cls_hidden = []
    c_true, c_pad = c1_true, C1
    for oc_base in (256, 128):
        oc_t = int(r * oc_base)
        oc_p = _rup(oc_t)
        w, b = _make_layer_params(keys[next(ki)], c_true, oc_t, with_bn=True)
        w_t = jnp.zeros((oc_p, c_pad), jnp.float32)
        w_t = w_t.at[:oc_t, :c_true].set(jnp.transpose(w))
        bias = jnp.zeros((oc_p, 1), jnp.float32).at[:oc_t, 0].set(b)
        cls_hidden.append((w_t.astype(jnp.bfloat16), bias))
        c_true, c_pad = oc_t, oc_p
        # Dropout(0.2) between classifier blocks: identity at inference.
    w_last, b_last = _make_layer_params(keys[next(ki)], c_true, num_classes,
                                        with_bn=False)
    w_last_t = jnp.zeros((num_classes, c_pad), jnp.float32)
    w_last_t = w_last_t.at[:, :c_true].set(jnp.transpose(w_last)).astype(jnp.bfloat16)

    return {
        "stacked": stacked,                  # bf16 (C1 + p_k, dim_{k-1})
        "biases": biases,                    # f32  (p_k, 1)
        "wc_last_t": wc_last_t,              # bf16 (C1, p_L)
        "wc_g": wc_g_p,                      # f32  (p_L, C1)
        "b_cls1": b_cls1_p,                  # f32  (C1,)
        "cls_hidden": cls_hidden,            # [(bf16 (oc_p, prev_p), f32 (oc_p,1))]
        "w_last_t": w_last_t,                # bf16 (num_classes, prev_p)
        "b_last": b_last.reshape(num_classes, 1),
        "C1": C1,
        "c_last_padded": c_last_p,
        "layer_dims_padded": padded_channels,
    }


# ----------------------------------------------------------------------------
# Forward pass (matches shapenet_PVCNN.forward for the supported config)
# ----------------------------------------------------------------------------
def shapenet_pvcnn_forward(inputs, params, *, tile_m=None):
    # inputs: (B, C_in, N), channels = [coords(3), extra features..., one-hot(S)]
    # Note: `features = inputs` in the reference, so the point branch consumes
    # ALL channels (including the one-hot), matching the PyTorch forward.
    B, C_in, N = inputs.shape
    c1 = params["C1"]
    vmem_limit, vmem_budget = _vmem_limit_and_budget()
    if tile_m is None:
        tile_m = _pick_tile_m(N, c_in=C_in, layer_dims=params["layer_dims_padded"],
                              c1=c1, vmem_budget=vmem_budget)
    assert N % tile_m == 0

    # Fused point branch + first-classifier partial (bf16) + per-batch global max.
    partial1, gmax = _point_branch_call(
        inputs, params["stacked"], params["biases"], params["wc_last_t"],
        c1, params["c_last_padded"], tile_m=tile_m, vmem_limit=vmem_limit)

    # Per-batch contribution of the broadcast global-max features to the first
    # classifier layer (tiny (B, C_last) x (C_last, C1) matmul) + its bias.
    gmax2 = gmax[:, :, 0]                                    # (B, C_last_p)
    gproj = jnp.einsum("bc,cd->bd", gmax2, params["wc_g"]) + params["b_cls1"]
    gproj = gproj[:, :, None]                                # (B, C1, 1) f32

    # Fused classifier; output is already (B, num_classes, N) — no transpose.
    return _classifier_call(partial1, gproj, params["cls_hidden"],
                            params["w_last_t"], params["b_last"],
                            tile_m=tile_m, vmem_limit=vmem_limit)


# ----------------------------------------------------------------------------
# Driver
# ----------------------------------------------------------------------------
if __name__ == "__main__":
    key = jax.random.PRNGKey(0)
    B, N = 2, 128
    num_shapes = 4
    extra_feature_channels = 7                 # 3 normals + 4 one-hot channels
    in_channels = 3 + extra_feature_channels   # 10
    num_classes = 8
    width_multiplier = 0.25
    blocks = ((16, 1, None), (32, 1, None))    # point-branch-only (PointNet-style)

    k_in, k_norm, k_shape, k_param = jax.random.split(key, 4)

    coords = jax.random.normal(k_in, (B, 3, N), jnp.float32)
    normals = jax.random.normal(k_norm, (B, 3, N), jnp.float32)
    normals = normals / jnp.linalg.norm(normals, axis=1, keepdims=True)
    shape_ids = jax.random.randint(k_shape, (B,), 0, num_shapes)
    one_hot = jax.nn.one_hot(shape_ids, num_shapes, dtype=jnp.float32)      # (B, S)
    one_hot = jnp.broadcast_to(one_hot[:, :, None], (B, num_shapes, N))     # (B, S, N)

    inputs = jnp.concatenate([coords, normals, one_hot], axis=1)            # (B, 10, N)

    params = init_shapenet_pvcnn_params(
        k_param,
        in_channels=in_channels,
        blocks=blocks,
        num_shapes=num_shapes,
        num_classes=num_classes,
        width_multiplier=width_multiplier,
    )

    out = shapenet_pvcnn_forward(inputs, params)
    out = jax.block_until_ready(out)
    assert out.shape == (B, num_classes, N), out.shape
    assert jnp.all(jnp.isfinite(out))
    print("KERNEL_OK")
</pallas_src>

<mosaic_0001>
module attributes {stable_mosaic.version = 11 : i64} {
  func.func @kernel(%arg0: i32, %arg1: i32, %arg2: memref<1x10x128xf32, #tpu.memory_space<vmem>>, %arg3: memref<80x10xbf16, #tpu.memory_space<vmem>>, %arg4: memref<80x16xbf16, #tpu.memory_space<vmem>>, %arg5: memref<16x1xf32, #tpu.memory_space<vmem>>, %arg6: memref<16x1xf32, #tpu.memory_space<vmem>>, %arg7: memref<64x16xbf16, #tpu.memory_space<vmem>>, %arg8: memref<1x64x128xbf16, #tpu.memory_space<vmem>>, %arg9: memref<1x16x1xf32, #tpu.memory_space<vmem>>) attributes {dimension_semantics = [#tpu.dimension_semantics<parallel>, #tpu.dimension_semantics<arbitrary>], iteration_bounds = array<i64: 2, 1>, scalar_prefetch = 0 : i64, scratch_operands = 0 : i64, tpu.core_type = #tpu.core_type<tc>, window_params = [{transform_indices = @transform_0, window_bounds = array<i64: 1, 10, 128>}, {pipeline_mode = #tpu.pipeline_mode<synchronous>, transform_indices = @transform_1, window_bounds = array<i64: 80, 10>}, {pipeline_mode = #tpu.pipeline_mode<synchronous>, transform_indices = @transform_2, window_bounds = array<i64: 80, 16>}, {pipeline_mode = #tpu.pipeline_mode<synchronous>, transform_indices = @transform_3, window_bounds = array<i64: 16, 1>}, {pipeline_mode = #tpu.pipeline_mode<synchronous>, transform_indices = @transform_4, window_bounds = array<i64: 16, 1>}, {pipeline_mode = #tpu.pipeline_mode<synchronous>, transform_indices = @transform_5, window_bounds = array<i64: 64, 16>}, {transform_indices = @transform_6, window_bounds = array<i64: 1, 64, 128>}, {transform_indices = @transform_7, window_bounds = array<i64: 1, 16, 1>}]} {
    %c0 = arith.constant 0 : index
    %c0_0 = arith.constant 0 : index
    %c0_1 = arith.constant 0 : index
    %0 = vector.load %arg2[%c0, %c0_0, %c0_1] : memref<1x10x128xf32, #tpu.memory_space<vmem>>, vector<1x10x128xf32>
    %1 = vector.shape_cast %0 : vector<1x10x128xf32> to vector<10x128xf32>
    %c0_2 = arith.constant 0 : index
    %c0_3 = arith.constant 0 : index
    %2 = vector.load %arg3[%c0_2, %c0_3] : memref<80x10xbf16, #tpu.memory_space<vmem>>, vector<80x10xbf16>
    %3 = arith.truncf %1 : vector<10x128xf32> to vector<10x128xbf16>
    %cst = arith.constant dense<0.000000e+00> : vector<80x128xf32>
    %4 = tpu.matmul %2, %3, %cst {dimension_numbers = #tpu.dot_dimension_numbers<[1], [0], [0], [1], [0, 0, 1, 1], [], []>} : vector<80x10xbf16>, vector<10x128xbf16>, vector<80x128xf32> -> vector<80x128xf32>
    %5 = vector.extract_strided_slice %4 {offsets = [0, 0], sizes = [64, 128], strides = [1, 1]} : vector<80x128xf32> to vector<64x128xf32>
    %6 = vector.extract_strided_slice %4 {offsets = [64, 0], sizes = [16, 128], strides = [1, 1]} : vector<80x128xf32> to vector<16x128xf32>
    %c0_4 = arith.constant 0 : index
    %c0_5 = arith.constant 0 : index
    %7 = vector.load %arg5[%c0_4, %c0_5] : memref<16x1xf32, #tpu.memory_space<vmem>>, vector<16x1xf32>
    %8 = vector.broadcast %7 : vector<16x1xf32> to vector<16x128xf32>
    %9 = arith.addf %6, %8 : vector<16x128xf32>
    %cst_6 = arith.constant 0.000000e+00 : f32
    %10 = vector.broadcast %cst_6 : f32 to vector<16x128xf32>
    %11 = arith.maximumf %9, %10 : vector<16x128xf32>
    %c0_7 = arith.constant 0 : index
    %c0_8 = arith.constant 0 : index
    %12 = vector.load %arg4[%c0_7, %c0_8] : memref<80x16xbf16, #tpu.memory_space<vmem>>, vector<80x16xbf16>
    %13 = arith.truncf %11 : vector<16x128xf32> to vector<16x128xbf16>
    %cst_9 = arith.constant dense<0.000000e+00> : vector<80x128xf32>
    %14 = tpu.matmul %12, %13, %cst_9 {dimension_numbers = #tpu.dot_dimension_numbers<[1], [0], [0], [1], [0, 0, 1, 1], [], []>} : vector<80x16xbf16>, vector<16x128xbf16>, vector<80x128xf32> -> vector<80x128xf32>
    %15 = vector.extract_strided_slice %14 {offsets = [0, 0], sizes = [64, 128], strides = [1, 1]} : vector<80x128xf32> to vector<64x128xf32>
    %16 = arith.addf %5, %15 : vector<64x128xf32>
    %17 = vector.extract_strided_slice %14 {offsets = [64, 0], sizes = [16, 128], strides = [1, 1]} : vector<80x128xf32> to vector<16x128xf32>
    %c0_10 = arith.constant 0 : index
    %c0_11 = arith.constant 0 : index
    %18 = vector.load %arg6[%c0_10, %c0_11] : memref<16x1xf32, #tpu.memory_space<vmem>>, vector<16x1xf32>
    %19 = vector.broadcast %18 : vector<16x1xf32> to vector<16x128xf32>
    %20 = arith.addf %17, %19 : vector<16x128xf32>
    %cst_12 = arith.constant 0.000000e+00 : f32
    %21 = vector.broadcast %cst_12 : f32 to vector<16x128xf32>
    %22 = arith.maximumf %20, %21 : vector<16x128xf32>
    %c0_13 = arith.constant 0 : index
    %c0_14 = arith.constant 0 : index
    %23 = vector.load %arg7[%c0_13, %c0_14] : memref<64x16xbf16, #tpu.memory_space<vmem>>, vector<64x16xbf16>
    %24 = arith.truncf %22 : vector<16x128xf32> to vector<16x128xbf16>
    %cst_15 = arith.constant dense<0.000000e+00> : vector<64x128xf32>
    %25 = tpu.matmul %23, %24, %cst_15 {dimension_numbers = #tpu.dot_dimension_numbers<[1], [0], [0], [1], [0, 0, 1, 1], [], []>} : vector<64x16xbf16>, vector<16x128xbf16>, vector<64x128xf32> -> vector<64x128xf32>
    %26 = arith.addf %16, %25 : vector<64x128xf32>
    %27 = arith.truncf %26 : vector<64x128xf32> to vector<64x128xbf16>
    %c0_16 = arith.constant 0 : index
    %c0_17 = arith.constant 0 : index
    %c0_18 = arith.constant 0 : index
    %28 = vector.load %arg8[%c0_16, %c0_17, %c0_18] : memref<1x64x128xbf16, #tpu.memory_space<vmem>>, vector<1x64x128xbf16>
    %29 = vector.shape_cast %28 : vector<1x64x128xbf16> to vector<64x128xbf16>
    %30 = vector.shape_cast %27 : vector<64x128xbf16> to vector<1x64x128xbf16>
    tpu.vector_store %arg8[%c0_16, %c0_17, %c0_18], %30 {strides = array<i32>} : memref<1x64x128xbf16, #tpu.memory_space<vmem>>, vector<1x64x128xbf16>,
    %cst_19 = arith.constant dense<0xFF800000> : vector<16xf32>
    %31 = vector.multi_reduction <maximumf>, %22, %cst_19 [1] : vector<16x128xf32> to vector<16xf32>
    %32 = vector.shape_cast %31 : vector<16xf32> to vector<16x1xf32>
    %c0_i32 = arith.constant 0 : i32
    %33 = arith.cmpi eq, %arg1, %c0_i32 : i32
    %34 = arith.extui %33 : i1 to i32
    %c0_i32_20 = arith.constant 0 : i32
    %35 = arith.cmpi ne, %34, %c0_i32_20 : i32
    scf.if %35 {
      %c0_23 = arith.constant 0 : index
      %c0_24 = arith.constant 0 : index
      %c0_25 = arith.constant 0 : index
      %39 = vector.load %arg9[%c0_23, %c0_24, %c0_25] : memref<1x16x1xf32, #tpu.memory_space<vmem>>, vector<1x16x1xf32>
      %40 = vector.shape_cast %39 : vector<1x16x1xf32> to vector<16x1xf32>
      %41 = vector.shape_cast %32 : vector<16x1xf32> to vector<1x16x1xf32>
      tpu.vector_store %arg9[%c0_23, %c0_24, %c0_25], %41 {strides = array<i32>} : memref<1x16x1xf32, #tpu.memory_space<vmem>>, vector<1x16x1xf32>,
    } else {
    }
    %c0_i32_21 = arith.constant 0 : i32
    %36 = arith.cmpi ne, %arg1, %c0_i32_21 : i32
    %37 = arith.extui %36 : i1 to i32
    %c0_i32_22 = arith.constant 0 : i32
    %38 = arith.cmpi ne, %37, %c0_i32_22 : i32
    scf.if %38 {
      %c0_23 = arith.constant 0 : index
      %c0_24 = arith.constant 0 : index
      %c0_25 = arith.constant 0 : index
      %39 = vector.load %arg9[%c0_23, %c0_24, %c0_25] : memref<1x16x1xf32, #tpu.memory_space<vmem>>, vector<1x16x1xf32>
      %40 = vector.shape_cast %39 : vector<1x16x1xf32> to vector<16x1xf32>
      %41 = arith.maximumf %40, %32 : vector<16x1xf32>
      %c0_26 = arith.constant 0 : index
      %c0_27 = arith.constant 0 : index
      %c0_28 = arith.constant 0 : index
      %42 = vector.load %arg9[%c0_26, %c0_27, %c0_28] : memref<1x16x1xf32, #tpu.memory_space<vmem>>, vector<1x16x1xf32>
      %43 = vector.shape_cast %42 : vector<1x16x1xf32> to vector<16x1xf32>
      %44 = vector.shape_cast %41 : vector<16x1xf32> to vector<1x16x1xf32>
      tpu.vector_store %arg9[%c0_26, %c0_27, %c0_28], %44 {strides = array<i32>} : memref<1x16x1xf32, #tpu.memory_space<vmem>>, vector<1x16x1xf32>,
    } else {
    }
    return
  }
  func.func @transform_0(%arg0: i32, %arg1: i32) -> (i32, i32, i32) {
    %c0_i32 = arith.constant 0 : i32
    %c0_i32_0 = arith.constant 0 : i32
    return %arg0, %c0_i32, %arg1 : i32, i32, i32
  }
  func.func @transform_1(%arg0: i32, %arg1: i32) -> (i32, i32) {
    %c0_i32 = arith.constant 0 : i32
    %c0_i32_0 = arith.constant 0 : i32
    %c0_i32_1 = arith.constant 0 : i32
    return %c0_i32, %c0_i32_0 : i32, i32
  }
  func.func @transform_2(%arg0: i32, %arg1: i32) -> (i32, i32) {
    %c0_i32 = arith.constant 0 : i32
    %c0_i32_0 = arith.constant 0 : i32
    %c0_i32_1 = arith.constant 0 : i32
    return %c0_i32, %c0_i32_0 : i32, i32
  }
  func.func @transform_3(%arg0: i32, %arg1: i32) -> (i32, i32) {
    %c0_i32 = arith.constant 0 : i32
    %c0_i32_0 = arith.constant 0 : i32
    %c0_i32_1 = arith.constant 0 : i32
    return %c0_i32, %c0_i32_0 : i32, i32
  }
  func.func @transform_4(%arg0: i32, %arg1: i32) -> (i32, i32) {
    %c0_i32 = arith.constant 0 : i32
    %c0_i32_0 = arith.constant 0 : i32
    %c0_i32_1 = arith.constant 0 : i32
    return %c0_i32, %c0_i32_0 : i32, i32
  }
  func.func @transform_5(%arg0: i32, %arg1: i32) -> (i32, i32) {
    %c0_i32 = arith.constant 0 : i32
    %c0_i32_0 = arith.constant 0 : i32
    %c0_i32_1 = arith.constant 0 : i32
    return %c0_i32, %c0_i32_0 : i32, i32
  }
  func.func @transform_6(%arg0: i32, %arg1: i32) -> (i32, i32, i32) {
    %c0_i32 = arith.constant 0 : i32
    %c0_i32_0 = arith.constant 0 : i32
    return %arg0, %c0_i32, %arg1 : i32, i32, i32
  }
  func.func @transform_7(%arg0: i32, %arg1: i32) -> (i32, i32, i32) {
    %c0_i32 = arith.constant 0 : i32
    %c0_i32_0 = arith.constant 0 : i32
    %c0_i32_1 = arith.constant 0 : i32
    return %arg0, %c0_i32, %c0_i32_0 : i32, i32, i32
  }
}

</mosaic_0001>

<bundles_post_ra>
// kernel: tpu_custom_call.1
= control target key start
LH: loop header
LB: loop body
LE: loop exit
PB: predicated region body
PF: predicated region fallthrough
CT: control target
= control target key end

     0   :  { %13 = vsyncpa [#allocation3], 0  ;;  %s1509_s0 = inlined_call_operand.vmem [shape: f32[2,10,128], index: 0, kind: input, shape index: {}]   ;;  %s1510_s1 = inlined_call_operand.vmem [shape: bf16[80,10], index: 1, kind: input, shape index: {}]   ;;  %s1511_s2 = inlined_call_operand.vmem [shape: bf16[80,16], index: 2, kind: input, shape index: {}]   ;;  %s1512_s3 = inlined_call_operand.vmem [shape: f32[16,1], index: 3, kind: input, shape index: {}]   ;;  %s1513_s4 = inlined_call_operand.vmem [shape: f32[16,1], index: 4, kind: input, shape index: {}]   ;;  %s1514_s5 = inlined_call_operand.vmem [shape: bf16[64,16], index: 5, kind: input, shape index: {}]   ;;  %s1515_s6 = inlined_call_operand.hbm [shape: bf16[2,64,128], index: 6, kind: output, shape index: {0}]   ;;  %s1516_s7 = inlined_call_operand.vmem [shape: f32[2,16,1], index: 7, kind: output, shape index: {1}]  }
   0x1   :  { %15 = vsyncpa [#allocation3 + $0x1], 0  ;;  %s1272_s24 = smov 0   ;;  %s1274_s25 = smov 0  }
   0x2   :  { %s1276_s26 = smov 0   ;;  %s1278_s27 = smov 0  }
   0x3   :  { %s1280_s28 = smov 0   ;;  %s1282_s29 = smov 0  }
   0x4 LB: > { %s914_s30 = sadd.s32 4294967295, %s1224_s29   ;;  %s915_s8 = sadd.s32 4294967294, %s1224_s29   ;;  %s1224_s29 = sphi %s1282_s29, %s21_s29   ;;  %s1220_s28 = sphi %s1280_s28, %s1523_s28   ;;  %s1216_s27 = sphi %s1278_s27, %s1522_s27   ;;  %s1212_s26 = sphi %s1276_s26, %s1521_s26   ;;  %s1208_s25 = sphi %s1274_s25, %s1520_s25   ;;  %s1204_s24 = sphi %s1272_s24, %s1519_s24  }
   0x5   : > { %s33_s9 = sadd.s32 1, %s1220_s28  ;;  %s175_s10 = sadd.s32 1, %s1212_s26 }
   0x6   : > { %p35_p0 = scmp.ge.s32.totalorder %s33_s9, 2  ;;  %p185_p1 = scmp.ne.s32.totalorder %s1212_s26, %s1208_s25 }
   0x7   : > { %p186_p2 = scmp.eq.s32.totalorder %s914_s30, 1  ;;  %p191_p3 = scmp.ne.s32.totalorder %s1208_s25, %s1204_s24 }
   0x8   : > { %s1525_s9 = smov (%p35_p0, %s33_s9), 0  ;;  %p192_p5 = scmp.eq.s32.totalorder %s915_s8, 1 }
   0x9   : > { %p1312_p4 = por %p186_p2, %p185_p1  ;;  %s170_s12 = ssub.s32 %s1220_s28, %s1525_s9 }
   0xa   : > { %p918_p6 = scmp.ge.s32.totalorder %s1224_s29, 1  ;;  %p173_p7 = scmp.eq.s32.totalorder %s170_s12, 0 }
   0xb   : > { %p1319_p8 = por %p192_p5, %p191_p3  ;;  %p262_p9 = scmp.lt.s32.totalorder %s1224_s29, 3 }
   0xc   : > { %s1325_s14 = scalar_select %p173_p7, %s1212_s26, %s175_s10  }
   0xd   : > { %p263_p10 = pnand %p918_p6, %p262_p9 }
   0xe   : > { %p302_p11 = scmp.lt.s32.totalorder (!%p263_p10), %s1216_s27, 1  ;;  %s292_s10 = sand.u32 (!%p263_p10), 1, %s1208_s25  }
   0xf   : > { %266 = sbr.rel (%p263_p10) target bundleno = 701 (0x2bd), region = 44  ;;  %s919_s12 = sshll.u32 (!%p263_p10), %s292_s10, 5 }
  0x10   : > { %s975_s15 = sshll.u32 (!%p263_p10), %s1216_s27, 9  ;;  %s1464_s21 = scalar_lea.sflag (!%p263_p10), [#allocation3], %s292_s10 }
  0x11   : > { %s1460_s20 = scalar_lea.hbm (!%p263_p10), %s1515_s6, %s975_s15  ;;  %s1229_s22 = smov (!%p263_p10), [#allocation2]  }
  0x14   : > { %v1226_v0 = vmov 0.0   ;;  %vm1227_vm0 = vmmov 0   ;;  %v447_v1 = vld [vmem:[%s1512_s3] sm:$0xff]  ;;  %s1335_s17 = scalar_select %p302_p11, %s1216_s27, 1  ;;  %v1228_v2 = vmov 0   ;;  %v448_v3 = vld [vmem:[%s1512_s3 + $0x8] sm:$0xff] }
  0x15   : > { %1070 = vmatprep.subr.bf16.mxu1 %v1226_v0  ;;  %1034 = vmatprep.mubr.msk.bf16.mxu1 %vm1227_vm0, %v1226_v0  ;;  %vm370_vm1 = vcmask 1044480   ;;  %v1134_v7 = vld [vmem:[%s1510_s1 + $0x20] sm:$0xff]   ;;  %vm354_vm2 = vcmask 80896   ;;  %v1137_v10 = vld [vmem:[%s1510_s1 + $0x8] sm:$0xff]   ;;  %v1139_v11 = vld [vmem:[%s1510_s1 + $0x10] sm:$0xff]   ;;  %vm499_vm3 = vcmask 130048  }
  0x16   : > { %1132 = vset.pattern.permute.xlu0 %v1228_v2  ;;  %1016 = vmatprep.subr.bf16.mxu0 %v1226_v0  ;;  %s965_s18 = sshll.u32 %s1335_s17, 4  ;;  %v1135_v9 = vld [vmem:[%s1510_s1] sm:$0xff]   ;;  %v1141_v12 = vld [vmem:[%s1510_s1 + $0x18] sm:$0xff]   ;;  %v597_v14 = vld [vmem:[%s1513_s4 + $0x8] sm:$0xff]  ;;  %vm774_vm4 = vcmask 7168   ;;  %s294_s17 = scalar_lea.vmem [#allocation2], %s919_s12 }
  0x17   : > { %451 = vperm.xlu0 %1132, %v447_v1   ;;  %1018 = vmatprep.mubr.msk.bf16.mxu0 %vm1227_vm0, %v1226_v0  ;;  %s309_s23 = scalar_lea.vmem %s1509_s0, %s965_s18  ;;  %v596_v13 = vld [vmem:[%s1513_s4] sm:$0xff]  ;;  %v1138_v27 = vld [vmem:[%s1511_s2 + $0x8] sm:$0xff]   ;;  %v1140_v28 = vld [vmem:[%s1511_s2 + $0x10] sm:$0xff]   ;;  %s314_s8 = scalar_lea.vmem %s1516_s7, %s965_s18 }
  0x18   : > { %1133 = vset.pattern.permute.xlu1 %v1228_v2  ;;  %v316_v4 = vld [vmem:[%s309_s23] sm:$0xff]  ;;  %v317_v5 = vld [vmem:[%s309_s23 + $0x8] sm:$0x3]  ;;  %v1142_v29 = vld [vmem:[%s1511_s2 + $0x18] sm:$0xff]   ;;  %s808_s18 = sshll.u32 %s294_s17, 4  ;;  %s1152_s23 = sshll.u32 %s1229_s22, 4  ;;  %s1455_s18 = int_to_ptr.vmem [resolvable:$true] %s808_s18  ;;  %s1153_s23 = int_to_ptr.vmem [resolvable:$false] %s1152_s23 }
  0x19   : > { %v328_v6 = vpack.c.bf16 %v317_v5, %v316_v4  ;;  %600 = vperm.xlu1 %1133, %v596_v13   ;;  %v1136_v26 = vld [vmem:[%s1511_s2] sm:$0xff]   ;;  %v1147_v13 = vld [vmem:[%s1514_s5 + $0x18] sm:$0xff]   ;;  %s1148_s27 = scalar_lea.vmem %s1455_s18, 512  ;;  %s1154_s30 = scalar_lea.vmem %s1153_s23, 1024 }
  0x1a   : > { %v1143_v30 = vld [vmem:[%s1511_s2 + $0x20] sm:$0xff]   ;;  %p1149_p12 = scmp.ne.s32.totalorder %s1455_s18, %s1148_s27  ;;  %p1155_p1 = scmp.lt.s32.totalorder %s1455_s18, %s1153_s23 }
  0x1b   : > { %456 = vperm.xlu0 %1132, %v448_v3   ;;  %v372_v8 = vsel %vm370_vm1, %v328_v6, 0  ;;  %v1144_v47 = vld [vmem:[%s1514_s5] sm:$0xff]   ;;  %p1156_p2 = scmp.lt.s32.totalorder %s1154_s30, %s1148_s27 }
  0x1c   : > { %1071 = vmatpush3.bf16.msra.mxu1 %v372_v8  ;;  %1017 = vmatpush3.bf16.msra.mxu0 %v372_v8  ;;  %p1150_p13 = pnand %p1149_p12, %p1312_p4 }
  0x1d   : > { %1038 = vmatprep.subr.bf16.mxu1 %v1226_v0  ;;  %605 = vperm.xlu1 %1133, %v597_v14   ;;  %p1157_p3 = por %p1156_p2, %p1155_p1 }
  0x1e   : > { %p1151_p0 = pneg %p1150_p13 }
  0x1f   : > { %1035 = vmatmul.mubr.msk.bf16.vlgmr.msra.gmra.mxu1 %vm354_vm2, %v1134_v7  ;;  %1019 = vmatmul.mubr.msk.bf16.vlgmr.msra.gmra.mxu0 %vm354_vm2, %v1135_v9 }
  0x20   : > { %1040 = vmatprep.mubr.msk.bf16.mxu1 %vm1227_vm0, %v1226_v0  ;;  %1022 = vmatprep.mubr.msk.bf16.mxu0 %vm1227_vm0, %v1226_v0  ;;  %p1158_p5 = pnand %p1157_p3, %p1151_p0 }
  0x27   : > { %1023 = vmatmul.mubr.msk.bf16.gmra.mxu0 %vm354_vm2, %v1137_v10 }
  0x28   : > { %1026 = vmatprep.mubr.msk.bf16.mxu0 %vm1227_vm0, %v1226_v0 }
  0x2f   : > { %1027 = vmatmul.mubr.msk.bf16.gmra.mxu0 %vm354_vm2, %v1139_v11  ;;  %v1145_v11 = vld [vmem:[%s1514_s5 + $0x8] sm:$0xff]  }
  0x30   : > { %1030 = vmatprep.mubr.msk.bf16.mxu0 %vm1227_vm0, %v1226_v0 }
  0x37   : > { %1031 = vmatmul.mubr.msk.bf16.gmra.mxu0 %vm354_vm2, %v1141_v12  ;;  %v1146_v12 = vld [vmem:[%s1514_s5 + $0x10] sm:$0xff]  }
  0x38   : > { %1062 = vmatprep.mubr.msk.bf16.mxu0 %vm499_vm3, %v1144_v47 }
  0x92   : > { %v452_v15 = vpop.permute.xlu0 %451 }
  0x94   : > { %v601_v63 = vpop.permute.xlu1 %600 }
  0x96   : > { %v457_v19 = vpop.permute.xlu0 %456 }
  0x98   : > { %v606_v5 = vpop.permute.xlu1 %605 }
  0xdf   : > { %v440_v16 = vpop.f32.mrf.mxu1  ;;  %v1412_v31 = vpop.f32.mrf.mxu0 }
  0xe0   : > { %v459_v18 = vadd.f32 %v452_v15, %v440_v16 }
  0xe1   : > { %v1036_v17 = vpop.f32.mrf.mxu1  ;;  %v1020_v32 = vpop.f32.mrf.mxu0 }
  0xe2   : > { %v461_v23 = vmax.f32 %v459_v18, 0.0 }
  0xe3   : > { %v443_v20 = vpop.f32.mrf.mxu1  ;;  %v1414_v33 = vpop.f32.mrf.mxu0 }
  0xe4   : > { %v460_v21 = vadd.f32 %v457_v19, %v443_v20 }
  0xe5   : > { %v1037_v22 = vpop.f32.mrf.mxu1  ;;  %v1021_v34 = vpop.f32.mrf.mxu0 }
  0xe6   : > { %v462_v24 = vmax.f32 %v460_v21, 0.0 }
  0xe7   : > { %v416_v35 = vpop.f32.mrf.mxu0 }
  0xe8   : > { %v473_v25 = vpack.c.bf16 %v462_v24, %v461_v23 }
  0xe9   : > { %v1024_v36 = vpop.f32.mrf.mxu0 }
  0xea   : > { %1039 = vmatpush3.bf16.msra.mxu1 %v473_v25 }
  0xeb   : > { %v419_v37 = vpop.f32.mrf.mxu0 }
  0xed   : > { %1041 = vmatmul.mubr.msk.bf16.vlgmr.msra.gmra.mxu1 %vm499_vm3, %v1136_v26  ;;  %v1025_v38 = vpop.f32.mrf.mxu0 }
  0xee   : > { %1044 = vmatprep.mubr.msk.bf16.mxu1 %vm1227_vm0, %v1226_v0 }
  0xef   : > { %v1416_v39 = vpop.f32.mrf.mxu0 }
  0xf1   : > { %v1028_v40 = vpop.f32.mrf.mxu0 }
  0xf3   : > { %v1418_v41 = vpop.f32.mrf.mxu0 }
  0xf5   : > { %1045 = vmatmul.mubr.msk.bf16.gmra.mxu1 %vm499_vm3, %v1138_v27  ;;  %v1029_v42 = vpop.f32.mrf.mxu0 }
  0xf6   : > { %1048 = vmatprep.mubr.msk.bf16.mxu1 %vm1227_vm0, %v1226_v0 }
  0xf7   : > { %v1420_v43 = vpop.f32.mrf.mxu0 }
  0xf9   : > { %v1032_v44 = vpop.f32.mrf.mxu0 }
  0xfb   : > { %v1422_v45 = vpop.f32.mrf.mxu0 }
  0xfd   : > { %1049 = vmatmul.mubr.msk.bf16.gmra.mxu1 %vm499_vm3, %v1140_v28  ;;  %v1033_v46 = vpop.f32.mrf.mxu0 }
  0xfe   : > { %1052 = vmatprep.mubr.msk.bf16.mxu1 %vm1227_vm0, %v1226_v0 }
 0x105   : > { %1053 = vmatmul.mubr.msk.bf16.gmra.mxu1 %vm499_vm3, %v1142_v29 }
 0x106   : > { %1056 = vmatprep.mubr.msk.bf16.mxu1 %vm1227_vm0, %v1226_v0 }
 0x10d   : > { %1057 = vmatmul.mubr.msk.bf16.gmra.mxu1 %vm499_vm3, %v1143_v30 }
 0x1ad   : > { %v549_v48 = vpop.f32.mrf.mxu1 }
 0x1ae   : > { %v588_v21 = vadd.f32 %v549_v48, %v1412_v31 }
 0x1af   : > { %v1042_v49 = vpop.f32.mrf.mxu1 }
 0x1b1   : > { %v552_v50 = vpop.f32.mrf.mxu1 }
 0x1b2   : > { %v589_v22 = vadd.f32 %v552_v50, %v1414_v33 }
 0x1b3   : > { %v1043_v51 = vpop.f32.mrf.mxu1 }
 0x1b5   : > { %v557_v52 = vpop.f32.mrf.mxu1 }
 0x1b6   : > { %v590_v18 = vadd.f32 %v557_v52, %v416_v35 }
 0x1b7   : > { %v1046_v53 = vpop.f32.mrf.mxu1 }
 0x1b9   : > { %v560_v54 = vpop.f32.mrf.mxu1 }
 0x1ba   : > { %v591_v19 = vadd.f32 %v560_v54, %v419_v37 }
 0x1bb   : > { %v1047_v55 = vpop.f32.mrf.mxu1 }
 0x1bd   : > { %v565_v56 = vpop.f32.mrf.mxu1 }
 0x1be   : > { %v592_v33 = vadd.f32 %v565_v56, %v1416_v39 }
 0x1bf   : > { %v1050_v57 = vpop.f32.mrf.mxu1 }
 0x1c1   : > { %v568_v58 = vpop.f32.mrf.mxu1 }
 0x1c2   : > { %v593_v36 = vadd.f32 %v568_v58, %v1418_v41 }
 0x1c3   : > { %v1051_v59 = vpop.f32.mrf.mxu1 }
 0x1c5   : > { %v573_v60 = vpop.f32.mrf.mxu1 }
 0x1c6   : > { %v594_v34 = vadd.f32 %v573_v60, %v1420_v43 }
 0x1c7   : > { %v1054_v61 = vpop.f32.mrf.mxu1 }
 0x1c9   : > { %v576_v62 = vpop.f32.mrf.mxu1 }
 0x1ca   : > { %v595_v35 = vadd.f32 %v576_v62, %v1422_v45 }
 0x1cb   : > { %v1055_v0 = vpop.f32.mrf.mxu1 }
 0x1cd   : > { %v581_v1 = vpop.f32.mrf.mxu1 }
 0x1ce   : > { %v608_v2 = vadd.f32 %v601_v63, %v581_v1 }
 0x1cf   : > { %v1058_v3 = vpop.f32.mrf.mxu1 }
 0x1d0   : > { %v610_v4 = vmax.f32 %v608_v2, 0.0 }
 0x1d1   : > { %v584_v6 = vpop.f32.mrf.mxu1 }
 0x1d2   : > { %v609_v7 = vadd.f32 %v606_v5, %v584_v6  ;;  %766 = vmax.xlane.f32.xlu0 %v610_v4 }
 0x1d3   : > { %v1059_v8 = vpop.f32.mrf.mxu1 }
 0x1d4   : > { %v611_v9 = vmax.f32 %v609_v7, 0.0 }
 0x1d6   : > { %v620_v10 = vpack.c.bf16 %v611_v9, %v610_v4  ;;  %768 = vmax.xlane.f32.xlu1 %v611_v9 }
 0x1d8   : > { %1060 = vmatprep.subr.bf16.mxu0 %v620_v10 }
 0x1d9   : > { %1061 = vmatpush3.bf16.msra.mxu0 %v620_v10 }
 0x1dc   : > { %1063 = vmatmul.mubr.msk.bf16.vlgmr.msra.gmra.mxu0 %vm499_vm3, %v1145_v11 }
 0x1dd   : > { %1066 = vmatprep.mubr.msk.bf16.mxu0 %vm499_vm3, %v1146_v12 }
 0x1e4   : > { %1067 = vmatmul.mubr.msk.bf16.gmra.mxu0 %vm499_vm3, %v1147_v13 }
 0x25b   : > { %v767_v14 = vpop.xlane.xlu0 %766 }
 0x25c   : > { %775 = vst.msk [vmem:[%s314_s8] sm:$0xff] %vm774_vm4, %v767_v14 }
 0x25f   : > { %v769_v15 = vpop.xlane.xlu1 %768 }
 0x260   : > { %776 = vst.msk [vmem:[%s314_s8 + $0x8] sm:$0xff] %vm774_vm4, %v769_v15 }
 0x29c   : > { %v1064_v16 = vpop.f32.mrf.mxu0 }
 0x29d   : > { %v720_v23 = vadd.f32 %v1064_v16, %v590_v18 }
 0x29e   : > { %v687_v17 = vpop.f32.mrf.mxu0 }
 0x29f   : > { %v718_v26 = vadd.f32 %v687_v17, %v588_v21 }
 0x2a0   : > { %v1065_v20 = vpop.f32.mrf.mxu0 }
 0x2a1   : > { %v721_v24 = vadd.f32 %v1065_v20, %v591_v19 }
 0x2a2   : > { %v690_v25 = vpop.f32.mrf.mxu0 }
 0x2a3   : > { %v984_v27 = vpack.c.bf16 %v721_v24, %v720_v23  ;;  %v719_v28 = vadd.f32 %v690_v25, %v589_v22 }
 0x2a4   : > { %v1068_v29 = vpop.f32.mrf.mxu0 }
 0x2a5   : > { %996 = vst [vmem:[%s294_s17 + $0x8] sm:$0xff] %v984_v27   ;;  %v979_v30 = vpack.c.bf16 %v719_v28, %v718_v26  ;;  %v724_v37 = vadd.f32 %v1068_v29, %v594_v34 }
 0x2a6   : > { %v703_v32 = vpop.f32.mrf.mxu0 }
 0x2a7   : > { %980 = vst [vmem:[%s294_s17] sm:$0xff] %v979_v30   ;;  %v722_v42 = vadd.f32 %v703_v32, %v592_v33 }
 0x2a8   : > { %v1069_v31 = vpop.f32.mrf.mxu0 }
 0x2a9   : > { %v725_v38 = vadd.f32 %v1069_v31, %v595_v35 }
 0x2aa   : > { %v706_v40 = vpop.f32.mrf.mxu0 }
 0x2ab   : > { %v994_v44 = vpack.c.bf16 %v725_v38, %v724_v37  ;;  %v723_v46 = vadd.f32 %v706_v40, %v593_v36 }
 0x2ad   : > { %998 = vst [vmem:[%s294_s17 + $0x18] sm:$0xff] %v994_v44   ;;  %v989_v39 = vpack.c.bf16 %v723_v46, %v722_v42 }
 0x2af   : > { %997 = vst [vmem:[%s294_s17 + $0x10] sm:$0xff] %v989_v39  }
 0x2b0   : > { %1161 = shalt.err (!%p1158_p5)
}
 0x2b1   : > { %s1162_s8 = scalar_lea.hbm %s1460_s20, 512  ;;  %s1166_s17 = scalar_lea.hbm %s1515_s6, 1024 }
 0x2b2   : > { %p1163_p6 = scmp.ne.s32.totalorder %s1460_s20, %s1162_s8  ;;  %p1167_p10 = scmp.lt.s32.totalorder %s1460_s20, %s1515_s6 }
 0x2b3   : > { %p1168_p11 = scmp.lt.s32.totalorder %s1166_s17, %s1162_s8 }
 0x2b4   : > { %p1164_p7 = pnand %p1163_p6, %p1312_p4 }
 0x2b5   : > { %p1169_p12 = por %p1168_p11, %p1167_p10 }
 0x2b6   : > { %p1165_p9 = pneg %p1164_p7 }
 0x2b8   : > { %p1170_p13 = pnand %p1169_p12, %p1165_p9 }
 0x2ba   : > { %1173 = shalt.err (!%p1170_p13)
}
 0x2bb   : > { %s1230_s19 = smov 64   ;;  %s1231_s27 = smov 4  }
 0x2bc   : > { %1072 = dma.vmem_to_hbm [thread:$0]  (%p1312_p4), %s1455_s18, 512, %s1460_s20, %s1464_s21, %s1230_s19, %s1230_s19, %s1231_s27  }
 0x2bd PF: > { %p1078_p0 = scmp.ge.s32.totalorder %s1224_s29, 2  ;;  %s826_s22 = sand.u32 1, %s1204_s24  }
 0x2be   : > { %s827_s23 = scalar_lea.sflag [#allocation3], %s826_s22 }
 0x2bf   : > { %p1075_p1 = pnand %p1078_p0, %p1319_p8 }
 0x2c1   : > { %p1076_p2 = pneg %p1075_p1 }
 0x2c3   : > { %1199 = dma.done.wait (%p1076_p2), %s827_s23, 512  }
 0x2c4   : > { %1201 = vsyncadd (%p1076_p2), %s827_s23, 4294966784  ;;  %s21_s29 = sadd.s32 1, %s1224_s29   ;;  %s1519_s24 = smov %s1208_s25 }
 0x2c5   : > { %p18_p3 = scmp.ge.s32.totalorder %s21_s29, 4   ;;  %s1520_s25 = smov %s1212_s26 }
 0x2c6   : > { %s1521_s26 = smov %s1325_s14  ;;  %s1522_s27 = smov %s1220_s28 }
 0x2c7   : > { %s1523_s28 = smov %s1525_s9  ;;  %20 = sbr.rel (!%p18_p3) target bundleno = 4 (0x4), region = 99 }
 0x2cc   :  { %840 = vsyncpa [#allocation3], 1 }
 0x2cd   :  { %842 = vsyncpa [#allocation3 + $0x1], 1 }

</bundles_post_ra>
